<compile_context>
chip_gen: v7x
topology: tpu7x:2x2x1
jax: 0.10.0
libtpu: 0.0.40
codegen_flags: <defaults>
</compile_context>

<pallas_src>
import functools

import jax
import jax.numpy as jnp
from jax.experimental import pallas as pl
from jax.experimental.pallas import tpu as pltpu


def _round_up(x, m):
    return ((x + m - 1) // m) * m


def _maybe_pad(a, target_shape):
    pads = [(0, t - s) for s, t in zip(a.shape, target_shape)]
    if any(p[1] for p in pads):
        a = jnp.pad(a, pads)
    return a


def _vmem_capacity_bytes():
    try:
        return int(pltpu.get_tpu_info().vmem_capacity_bytes)
    except Exception:
        return 64 * 1024 * 1024  # conservative (v7x-sized) fallback


def linear_tanh_kernel(x_ref, w_ref, b_ref, o_ref):
    """One (TM, TN) f32 output tile, accumulated in place over the K grid axis.

    x_ref: [TM, TK]  bf16 activation tile
    w_ref: [TK, TN]  bf16 weight tile (already [IN, OUT] orientation)
    b_ref: [1,  TN]  f32 bias tile for this N block
    o_ref: [TM, TN]  f32 output tile (resident across the K axis)
    """
    k = pl.program_id(2)

    @pl.when(k == 0)
    def _():
        o_ref[...] = jnp.zeros_like(o_ref)

    # bf16 x bf16 -> f32 on the MXU, native [M,K] x [K,N] orientation.
    o_ref[...] += jnp.dot(
        x_ref[...], w_ref[...], preferred_element_type=jnp.float32
    )

    @pl.when(k == pl.num_programs(2) - 1)
    def _():
        # f32 bias add + tanh once, after the full K reduction.
        o_ref[...] = jnp.tanh(o_ref[...] + b_ref[...])


@functools.partial(jax.jit, static_argnames=("tm", "tn", "tk"))
def linear_tanh(x, weight, bias, *, tm=256, tn=512, tk=512):
    """x: [B, IN] f32, weight: [OUT, IN] f32 (PyTorch layout), bias: [OUT] f32.

    Returns f32 [B, OUT] = tanh(x @ weight.T + bias).
    """
    B, IN = x.shape
    OUT = weight.shape[0]

    # Pad to TPU-friendly sizes: last dim (lanes) to 128, second-last to 8.
    Mp = _round_up(B, 8)
    Np = _round_up(OUT, 128)
    Kp = _round_up(IN, 128)

    TM = min(tm, Mp)
    TN = min(tn, Np)
    TK = min(tk, Kp)

    # Make the padded extents exact multiples of the tile sizes.
    Mp = _round_up(Mp, TM)
    Np = _round_up(Np, TN)
    Kp = _round_up(Kp, TK)

    # bf16 operands (cast before padding so any pad copy is half-width);
    # weight transposed once to [IN, OUT] so the kernel streams [TK, TN].
    xp = _maybe_pad(x.astype(jnp.bfloat16), (Mp, Kp))
    wp = _maybe_pad(weight.T.astype(jnp.bfloat16), (Kp, Np))
    bp = _maybe_pad(bias.reshape(1, OUT), (1, Np))  # bias stays f32

    grid = (Mp // TM, Np // TN, Kp // TK)
    grid_m, grid_n, grid_k = grid

    # Double-buffered bf16 x/w tiles + double-buffered f32 out tile + bias.
    tile_bytes = 2 * (TM * TK * 2) + 2 * (TK * TN * 2) + 2 * (TM * TN * 4) + 4 * TN
    cap = _vmem_capacity_bytes()
    if cap >= 96 * 1024 * 1024:
        # v5e / v6e: 128 MiB physical VMEM -> allow big blocks.
        vmem_limit = min(100 * 1024 * 1024, max(32 * 1024 * 1024, 2 * tile_bytes))
    else:
        # v7x: 64 MiB physical, 2 TCs per chip -> keep per-core footprint modest.
        vmem_limit = min(48 * 1024 * 1024, max(32 * 1024 * 1024, 2 * tile_bytes))

    # bytes_accessed accounts for re-streaming: x once per N block, w once per
    # M block (both bf16), plus the f32 output and bias.
    cost = pl.CostEstimate(
        flops=2 * Mp * Kp * Np,
        transcendentals=Mp * Np,
        bytes_accessed=(
            2 * Mp * Kp * grid_n + 2 * Kp * Np * grid_m + 4 * Mp * Np + 4 * Np
        ),
    )

    out_padded = pl.pallas_call(
        linear_tanh_kernel,
        out_shape=jax.ShapeDtypeStruct((Mp, Np), jnp.float32),
        grid_spec=pltpu.PrefetchScalarGridSpec(
            num_scalar_prefetch=0,
            grid=grid,
            in_specs=[
                pl.BlockSpec((TM, TK), lambda i, j, k: (i, k)),  # x   [M, K] bf16
                pl.BlockSpec((TK, TN), lambda i, j, k: (k, j)),  # w^T [K, N] bf16
                pl.BlockSpec((1, TN), lambda i, j, k: (0, j)),   # bias [1, N] f32
            ],
            out_specs=pl.BlockSpec((TM, TN), lambda i, j, k: (i, j)),
        ),
        compiler_params=pltpu.CompilerParams(
            dimension_semantics=("parallel", "parallel", "arbitrary"),
            vmem_limit_bytes=vmem_limit,
        ),
        cost_estimate=cost,
    )(xp, wp, bp)

    return out_padded[:B, :OUT]


def _reference(x, weight, bias):
    # Reference with the same bf16 operand rounding the kernel applies, but
    # exact f32 accumulation, so tolerances can stay tight.
    xb = x.astype(jnp.bfloat16).astype(jnp.float32)
    wb = weight.astype(jnp.bfloat16).astype(jnp.float32)
    y = jax.lax.dot_general(
        xb, wb,
        dimension_numbers=(((1,), (1,)), ((), ())),
        precision=jax.lax.Precision.HIGHEST,
    )
    return jnp.tanh(y + bias)


if __name__ == "__main__":
    key = jax.random.PRNGKey(0)

    # Case 1: small square-ish shapes (batch=8, hidden=32).
    B, IN, OUT = 8, 32, 32
    k1, k2, k3, key = jax.random.split(key, 4)
    bound = 1.0 / jnp.sqrt(jnp.float32(IN))
    x = jax.random.normal(k1, (B, IN), dtype=jnp.float32)
    w = jax.random.uniform(k2, (OUT, IN), jnp.float32, -bound, bound)
    b = jax.random.uniform(k3, (OUT,), jnp.float32, -bound, bound)
    out = jax.block_until_ready(linear_tanh(x, w, b))
    ref = _reference(x, w, b)
    assert out.shape == ref.shape, "case1: shape mismatch vs reference"
    assert jnp.allclose(out, ref, atol=1e-4, rtol=1e-4), "case1: mismatch vs reference"

    # Case 2: shape implied by the module's x1 = torch.randn(1, 300): a Linear
    # over 300 input features producing 1 output (exercises K/N padding).
    B2, IN2, OUT2 = 1, 300, 1
    k1, k2, k3, key = jax.random.split(key, 4)
    bound2 = 1.0 / jnp.sqrt(jnp.float32(IN2))
    x2 = jax.random.normal(k1, (B2, IN2), dtype=jnp.float32)
    w2 = jax.random.uniform(k2, (OUT2, IN2), jnp.float32, -bound2, bound2)
    b2 = jax.random.uniform(k3, (OUT2,), jnp.float32, -bound2, bound2)
    out2 = jax.block_until_ready(linear_tanh(x2, w2, b2))
    ref2 = _reference(x2, w2, b2)
    assert out2.shape == ref2.shape, "case2: shape mismatch vs reference"
    assert jnp.allclose(out2, ref2, atol=1e-4, rtol=1e-4), "case2: mismatch vs reference"

    print("KERNEL_OK")
</pallas_src>

<mosaic_0001>
module attributes {stable_mosaic.version = 11 : i64} {
  func.func @linear_tanh_kernel(%arg0: i32, %arg1: i32, %arg2: i32, %arg3: memref<8x128xbf16, #tpu.memory_space<vmem>>, %arg4: memref<128x128xbf16, #tpu.memory_space<vmem>>, %arg5: memref<1x128xf32, #tpu.memory_space<vmem>>, %arg6: memref<8x128xf32, #tpu.memory_space<vmem>>) attributes {dimension_semantics = [#tpu.dimension_semantics<parallel>, #tpu.dimension_semantics<parallel>, #tpu.dimension_semantics<arbitrary>], iteration_bounds = array<i64: 1, 1, 1>, scalar_prefetch = 0 : i64, scratch_operands = 0 : i64, tpu.core_type = #tpu.core_type<tc>, window_params = [{transform_indices = @transform_0, window_bounds = array<i64: 8, 128>}, {transform_indices = @transform_1, window_bounds = array<i64: 128, 128>}, {transform_indices = @transform_2, window_bounds = array<i64: 1, 128>}, {transform_indices = @transform_3, window_bounds = array<i64: 8, 128>}]} {
    %c0_i32 = arith.constant 0 : i32
    %0 = arith.cmpi eq, %arg2, %c0_i32 : i32
    %1 = arith.extui %0 : i1 to i32
    %c0_i32_0 = arith.constant 0 : i32
    %2 = arith.cmpi ne, %1, %c0_i32_0 : i32
    scf.if %2 {
      %cst_10 = arith.constant 0.000000e+00 : f32
      %12 = vector.broadcast %cst_10 : f32 to vector<8x128xf32>
      %c0_11 = arith.constant 0 : index
      %c0_12 = arith.constant 0 : index
      %13 = vector.load %arg6[%c0_11, %c0_12] : memref<8x128xf32, #tpu.memory_space<vmem>>, vector<8x128xf32>
      tpu.vector_store %arg6[%c0_11, %c0_12], %12 {strides = array<i32>} : memref<8x128xf32, #tpu.memory_space<vmem>>, vector<8x128xf32>,
    } else {
    }
    %c0 = arith.constant 0 : index
    %c0_1 = arith.constant 0 : index
    %3 = vector.load %arg6[%c0, %c0_1] : memref<8x128xf32, #tpu.memory_space<vmem>>, vector<8x128xf32>
    %c0_2 = arith.constant 0 : index
    %c0_3 = arith.constant 0 : index
    %4 = vector.load %arg3[%c0_2, %c0_3] : memref<8x128xbf16, #tpu.memory_space<vmem>>, vector<8x128xbf16>
    %c0_4 = arith.constant 0 : index
    %c0_5 = arith.constant 0 : index
    %5 = vector.load %arg4[%c0_4, %c0_5] : memref<128x128xbf16, #tpu.memory_space<vmem>>, vector<128x128xbf16>
    %cst = arith.constant dense<0.000000e+00> : vector<8x128xf32>
    %6 = tpu.matmul %4, %5, %cst {dimension_numbers = #tpu.dot_dimension_numbers<[1], [0], [0], [1], [0, 0, 1, 1], [], []>} : vector<8x128xbf16>, vector<128x128xbf16>, vector<8x128xf32> -> vector<8x128xf32>
    %7 = arith.addf %3, %6 : vector<8x128xf32>
    %c0_6 = arith.constant 0 : index
    %c0_7 = arith.constant 0 : index
    %8 = vector.load %arg6[%c0_6, %c0_7] : memref<8x128xf32, #tpu.memory_space<vmem>>, vector<8x128xf32>
    tpu.vector_store %arg6[%c0_6, %c0_7], %7 {strides = array<i32>} : memref<8x128xf32, #tpu.memory_space<vmem>>, vector<8x128xf32>,
    %c0_i32_8 = arith.constant 0 : i32
    %9 = arith.cmpi eq, %arg2, %c0_i32_8 : i32
    %10 = arith.extui %9 : i1 to i32
    %c0_i32_9 = arith.constant 0 : i32
    %11 = arith.cmpi ne, %10, %c0_i32_9 : i32
    scf.if %11 {
      %c0_10 = arith.constant 0 : index
      %c0_11 = arith.constant 0 : index
      %12 = vector.load %arg6[%c0_10, %c0_11] : memref<8x128xf32, #tpu.memory_space<vmem>>, vector<8x128xf32>
      %c0_12 = arith.constant 0 : index
      %c0_13 = arith.constant 0 : index
      %13 = vector.load %arg5[%c0_12, %c0_13] : memref<1x128xf32, #tpu.memory_space<vmem>>, vector<1x128xf32>
      %14 = vector.broadcast %13 : vector<1x128xf32> to vector<8x128xf32>
      %15 = arith.addf %12, %14 : vector<8x128xf32>
      %16 = math.tanh %15 : vector<8x128xf32>
      %c0_14 = arith.constant 0 : index
      %c0_15 = arith.constant 0 : index
      %17 = vector.load %arg6[%c0_14, %c0_15] : memref<8x128xf32, #tpu.memory_space<vmem>>, vector<8x128xf32>
      tpu.vector_store %arg6[%c0_14, %c0_15], %16 {strides = array<i32>} : memref<8x128xf32, #tpu.memory_space<vmem>>, vector<8x128xf32>,
    } else {
    }
    return
  }
  func.func @transform_0(%arg0: i32, %arg1: i32, %arg2: i32) -> (i32, i32) {
    %c0_i32 = arith.constant 0 : i32
    return %arg0, %arg2 : i32, i32
  }
  func.func @transform_1(%arg0: i32, %arg1: i32, %arg2: i32) -> (i32, i32) {
    %c0_i32 = arith.constant 0 : i32
    return %arg2, %arg1 : i32, i32
  }
  func.func @transform_2(%arg0: i32, %arg1: i32, %arg2: i32) -> (i32, i32) {
    %c0_i32 = arith.constant 0 : i32
    %c0_i32_0 = arith.constant 0 : i32
    return %c0_i32, %arg1 : i32, i32
  }
  func.func @transform_3(%arg0: i32, %arg1: i32, %arg2: i32) -> (i32, i32) {
    %c0_i32 = arith.constant 0 : i32
    return %arg0, %arg1 : i32, i32
  }
}

</mosaic_0001>

<bundles_post_ra>
// kernel: linear_tanh.1
= control target key start
LH: loop header
LB: loop body
LE: loop exit
PB: predicated region body
PF: predicated region fallthrough
CT: control target
= control target key end

     0   :  { %v232_v1 = vmov 0.0   ;;  %vm233_vm0 = vmmov 0   ;;  %s297_s0 = inlined_call_operand.vmem [shape: bf16[8,128], index: 0, kind: input, shape index: {}]   ;;  %s298_s1 = inlined_call_operand.vmem [shape: bf16[128,128], index: 1, kind: input, shape index: {}]   ;;  %s299_s2 = inlined_call_operand.vmem [shape: f32[1,128], index: 2, kind: input, shape index: {}]   ;;  %s300_s3 = inlined_call_operand.hbm [shape: f32[8,128], index: 3, kind: output, shape index: {}]  }
   0x1   :  { %v198_v0 = vld [vmem:[%s298_s1] sm:$0xff]   ;;  %175 = vmatprep.subr.bf16.mxu0 %v232_v1  ;;  %v199_v2 = vld [vmem:[%s298_s1 + $0x8] sm:$0xff]   ;;  %191 = vmatprep.mubr.msk.bf16.mxu0 %vm233_vm0, %v232_v1  ;;  %v200_v3 = vld [vmem:[%s298_s1 + $0x10] sm:$0xff]  }
   0x2   :  { %176 = vmatpush3.bf16.msra.mxu0 %v198_v0 }
   0x3   :  { %177 = vmatprep.subr.bf16.mxu0 %v232_v1 }
   0x6   :  { %178 = vmatpush3.bf16.msra.mxu0 %v199_v2 }
   0x7   :  { %179 = vmatprep.subr.bf16.mxu0 %v232_v1 }
   0x8   :  { %8 = vsyncpa [#allocation3], 0  ;;  %v201_v4 = vld [vmem:[%s298_s1 + $0x18] sm:$0xff]   ;;  %v202_v5 = vld [vmem:[%s298_s1 + $0x20] sm:$0xff]   ;;  %s234_s5 = smov [#allocation2]  }
   0x9   :  { %v203_v6 = vld [vmem:[%s298_s1 + $0x28] sm:$0xff]   ;;  %v204_v7 = vld [vmem:[%s298_s1 + $0x30] sm:$0xff]   ;;  %v205_v8 = vld [vmem:[%s298_s1 + $0x38] sm:$0xff]   ;;  %s149_s6 = sshll.u32 %s234_s5, 4  ;;  %s150_s6 = int_to_ptr.vmem [resolvable:$true] %s149_s6 }
   0xa   :  { %180 = vmatpush3.bf16.msra.mxu0 %v200_v3  ;;  %v22_v9 = vld [vmem:[%s297_s0] sm:$0xf]  ;;  %s208_s1 = scalar_lea.vmem %s150_s6, 128  ;;  %p213_p1 = scmp.lt.s32.totalorder %s150_s6, %s150_s6 }
   0xb   :  { %181 = vmatprep.subr.bf16.mxu0 %v232_v1  ;;  %v165_v11 = vld [vmem:[%s299_s2] ss:$0 sm:$0xff]  ;;  %p209_p0 = scmp.ne.s32.totalorder %s150_s6, %s208_s1  ;;  %p214_p2 = scmp.lt.s32.totalorder %s208_s1, %s208_s1 }
   0xd   :  { %p215_p3 = por %p214_p2, %p213_p1 }
   0xe   :  { %182 = vmatpush3.bf16.msra.mxu0 %v201_v4 }
   0xf   :  { %183 = vmatprep.subr.bf16.mxu0 %v232_v1  ;;  %p216_p4 = pnand %p215_p3, %p209_p0 }
  0x12   :  { %184 = vmatpush3.bf16.msra.mxu0 %v202_v5 }
  0x13   :  { %185 = vmatprep.subr.bf16.mxu0 %v232_v1 }
  0x16   :  { %186 = vmatpush3.bf16.msra.mxu0 %v203_v6 }
  0x17   :  { %187 = vmatprep.subr.bf16.mxu0 %v232_v1 }
  0x1a   :  { %188 = vmatpush3.bf16.msra.mxu0 %v204_v7 }
  0x1b   :  { %189 = vmatprep.subr.bf16.mxu0 %v232_v1 }
  0x1e   :  { %190 = vmatpush3.bf16.msra.mxu0 %v205_v8 }
  0x21   :  { %192 = vmatmul.mubr.bf16.vlgmr.msra.gmra.mrb[0].mxu0 %v22_v9 }
  0xf4   :  { %v121_v10 = vpop.f32.mrb[0].mxu0 }
  0xf5   :  { %v193_v12 = vpop.f32.mrb[1].mxu0  ;;  %v140_v15 = vadd.f32 %v165_v11, %v121_v10 }
  0xf6   :  { %v124_v13 = vpop.f32.mrb[2].mxu0 }
  0xf7   :  { %v194_v14 = vpop.f32.mrb[3].mxu0  ;;  %206 = vtanh.f32 %v140_v15 }
 0x101   :  { %v207_v16 = vpop.eup %206 }
 0x102   :  { %142 = vst [vmem:[#allocation2] sm:$0xff] %v207_v16 }
 0x103   :  { %219 = shalt.err (!%p216_p4)
}
 0x104   :  { %s220_s2 = scalar_lea.hbm %s300_s3, 128 }
 0x105   :  { %p221_p5 = scmp.ne.s32.totalorder %s300_s3, %s220_s2  ;;  %p224_p6 = scmp.lt.u32.totalorder %s220_s2, %s300_s3 }
 0x107   :  { %p226_p7 = pnand %p224_p6, %p221_p5 }
 0x109   :  { %229 = shalt.err (!%p226_p7)
}
 0x10a   :  { %152 = dma.vmem_to_hbm [thread:$0]  %s150_s6, 128, %s300_s3, [#allocation3]  }
 0x10b   :  { %230 = dma.done.wait [#allocation3], 128  }
 0x10c   :  { %231 = vsyncadd [#allocation3], 4294967168 }
 0x10d   :  { %156 = vsyncpa [#allocation3], 1 }

</bundles_post_ra>
